<compile_context>
chip_gen: v5e
topology: v5e:2x2
jax: 0.10.0
libtpu: 0.0.40
codegen_flags: <defaults>
</compile_context>

<pallas_src>
import jax
import jax.numpy as jnp
from jax.experimental import pallas as pl
from jax.experimental.pallas import tpu as pltpu

# MXU operand / storage dtype for x and weights. Epilogue (shift + ReLU) and
# matmul accumulation remain f32.
COMPUTE_DTYPE = jnp.bfloat16

_LANE = 128
_SUBLANE = 8
_BN_EPS = 1e-5
_VMEM_ACT_BUDGET = 40 * 1024 * 1024   # activation/pipeline budget (v7x-safe)
_VMEM_LIMIT = 48 * 1024 * 1024        # explicit scoped-VMEM cap (< 64 MiB)


def _round_up(x, m):
    return ((x + m - 1) // m) * m


# ----------------------------------------------------------------------------
# Fused Pallas kernel
# ----------------------------------------------------------------------------
def _make_fused_mlp_kernel(num_relu_layers):
    """Kernel over refs laid out as:
         [x, (w, shift) * num_relu_layers, w_out, shift_out, o]
    Each ReLU layer computes h = relu(h @ W + shift) with the Linear bias and
    eval-BatchNorm (scale folded into W's columns, shift kept separate); the
    final layer is h @ W_out + bias. Everything stays VMEM-resident.
    """

    def kernel(*refs):
        x_ref = refs[0]
        o_ref = refs[-1]
        h = x_ref[...]                       # bf16 (cast done in the wrapper)
        idx = 1
        for _ in range(num_relu_layers):
            w_ref, t_ref = refs[idx], refs[idx + 1]
            idx += 2
            z = jnp.dot(h, w_ref[...], preferred_element_type=jnp.float32)
            # f32 epilogue, then cast back to bf16 for the next MXU pass.
            h = jnp.maximum(z + t_ref[...], 0.0).astype(COMPUTE_DTYPE)
        w_ref, t_ref = refs[idx], refs[idx + 1]
        z = jnp.dot(h, w_ref[...], preferred_element_type=jnp.float32) + t_ref[...]
        o_ref[...] = z.astype(o_ref.dtype)

    return kernel


def metabolite_classifier_forward(x, fused, output_dim, num_classes, *,
                                  batch_tile=2048):
    """Single fused pallas_call for the whole forward pass."""
    B, F = x.shape
    layers = fused["layers"]            # [(W [K,N] bf16, shift [1,N] f32), ...]
    w_out, t_out = fused["out"]         # [H, N_pad] bf16, [1, N_pad] f32
    out_width = output_dim * num_classes
    n_pad = w_out.shape[1]
    h_dim = w_out.shape[0]

    compute_dtype = layers[0][0].dtype
    in_itemsize = layers[0][0].dtype.itemsize      # bf16 -> 2
    out_itemsize = 4                               # f32 logits

    weight_bytes = sum(int(w.size) * w.dtype.itemsize +
                       int(t.size) * t.dtype.itemsize for (w, t) in layers)
    weight_bytes += int(w_out.size) * w_out.dtype.itemsize
    weight_bytes += int(t_out.size) * t_out.dtype.itemsize

    # Per-row VMEM: double-buffered x + out, plus ~2 live f32 activation temps.
    max_hidden = max(w.shape[1] for (w, _) in layers)
    per_row = 2 * (F * in_itemsize + n_pad * out_itemsize) + 2 * max_hidden * 4

    rows = _round_up(B, _SUBLANE)
    tb = min(batch_tile, rows)
    # Shrink the tile so activations + pipeline buffers fit the VMEM budget
    # (matters for the real input_dim=5835 model; no-op at toy sizes).
    fit_tb = max(_SUBLANE,
                 ((_VMEM_ACT_BUDGET - weight_bytes) // max(per_row, 1))
                 // _SUBLANE * _SUBLANE)
    tb = min(tb, fit_tb)
    # v7x has 2 TensorCores: if the whole (large) batch fits in one tile, split
    # it into two parallel tiles so both cores get work. Single-TC v5e/v6e only
    # pay one extra ~0.35 us grid step.
    if tb == rows and rows >= 256:
        tb = _round_up((rows + 1) // 2, _SUBLANE)

    b_pad = _round_up(B, tb)
    x = x.astype(compute_dtype)          # cast OUTSIDE the kernel: halves x DMA
    if b_pad != B:
        x = jnp.pad(x, ((0, b_pad - B), (0, 0)))
    grid = (b_pad // tb,)

    # x streams per-tile; weights/shifts are pinned to block (0,0) so they stay
    # VMEM-resident across all grid steps.
    # TODO(synk): if xprof on v6e shows exposed x DMA, add
    #   pipeline_mode=pl.Buffered(3) to the x BlockSpec only.
    in_specs = [pl.BlockSpec((tb, F), lambda i: (i, 0))]
    operands = [x]
    for (w, t) in layers:
        k, n = w.shape
        in_specs += [
            pl.BlockSpec((k, n), lambda i: (0, 0)),
            pl.BlockSpec((1, n), lambda i: (0, 0)),
        ]
        operands += [w, t]
    in_specs += [
        pl.BlockSpec((h_dim, n_pad), lambda i: (0, 0)),
        pl.BlockSpec((1, n_pad), lambda i: (0, 0)),
    ]
    operands += [w_out, t_out]

    flops = 2 * b_pad * h_dim * n_pad
    for (w, _) in layers:
        flops += 2 * b_pad * w.shape[0] * w.shape[1]
    bytes_accessed = (b_pad * F * in_itemsize          # x (bf16)
                      + weight_bytes                   # resident params
                      + b_pad * n_pad * out_itemsize)  # f32 writeback
    cost = pl.CostEstimate(flops=int(flops), transcendentals=0,
                           bytes_accessed=int(bytes_accessed))

    out = pl.pallas_call(
        _make_fused_mlp_kernel(len(layers)),
        out_shape=jax.ShapeDtypeStruct((b_pad, n_pad), jnp.float32),
        grid=grid,
        in_specs=in_specs,
        out_specs=pl.BlockSpec((tb, n_pad), lambda i: (i, 0)),
        compiler_params=pltpu.CompilerParams(
            dimension_semantics=("parallel",),      # shard batch tiles on v7x
            vmem_limit_bytes=_VMEM_LIMIT),          # explicit, v7x-safe cap
        cost_estimate=cost,
    )(*operands)

    out = out[:B, :out_width]                       # drop batch + lane padding
    return out.reshape(B, output_dim, num_classes)


# ----------------------------------------------------------------------------
# Parameter construction (raw, PyTorch-shaped) and folding (kernel-shaped)
# ----------------------------------------------------------------------------
def _bn_params(key, dim):
    k1, k2, k3, k4 = jax.random.split(key, 4)
    return {
        "gamma": 1.0 + 0.01 * jax.random.normal(k1, (dim,), jnp.float32),
        "beta": 0.01 * jax.random.normal(k2, (dim,), jnp.float32),
        "mean": 0.1 * jax.random.normal(k3, (dim,), jnp.float32),
        "var": 1.0 + 0.1 * jax.random.uniform(k4, (dim,), jnp.float32),
    }


def _linear_params(key, din, dout):
    k1, k2 = jax.random.split(key)
    return {
        "w": jax.random.normal(k1, (din, dout), jnp.float32) / jnp.sqrt(din),
        "b": 0.01 * jax.random.normal(k2, (dout,), jnp.float32),
    }


def make_raw_params(key, input_dim, hidden_dims, output_dim, num_classes):
    keys = iter(jax.random.split(key, 4 * (len(hidden_dims) + 3)))
    raw = {"input_bn": _bn_params(next(keys), input_dim)}
    dims = [input_dim] + list(hidden_dims)
    raw["blocks"] = [
        {"lin": _linear_params(next(keys), dims[i], dims[i + 1]),
         "bn": _bn_params(next(keys), dims[i + 1])}
        for i in range(len(hidden_dims))
    ]
    h = hidden_dims[-1]
    raw["final_pre"] = {"lin": _linear_params(next(keys), h, h),
                        "bn": _bn_params(next(keys), h)}
    raw["final_out"] = _linear_params(next(keys), h, output_dim * num_classes)
    return raw


def fold_params(raw, *, lane=_LANE, eps=_BN_EPS, compute_dtype=COMPUTE_DTYPE):
    """Fold input-BN into the first Linear, fold each eval-BN's scale into the
    weight columns and its (bias+shift) into a per-feature f32 shift, cast the
    weights to the MXU storage dtype, and lane-pad the final projection."""

    def bn_scale_shift(bn):
        inv_std = 1.0 / jnp.sqrt(bn["var"] + eps)
        s = bn["gamma"] * inv_std
        t = bn["beta"] - bn["mean"] * s
        return s, t

    in_s, in_t = bn_scale_shift(raw["input_bn"])

    layers = []
    relu_blocks = raw["blocks"] + [raw["final_pre"]]
    for i, blk in enumerate(relu_blocks):
        w, b = blk["lin"]["w"], blk["lin"]["b"]
        if i == 0:
            # (x*in_s + in_t) @ W + b == x @ (in_s[:,None]*W) + (in_t@W + b)
            b = in_t @ w + b
            w = in_s[:, None] * w
        s, t = bn_scale_shift(blk["bn"])
        n = w.shape[1]
        w = (w * s[None, :]).astype(compute_dtype)   # (h@W)*s == h@(W*s)
        shift = (b * s + t).reshape(1, n).astype(jnp.float32)
        layers.append((w, shift))

    # Final projection: bias-only epilogue, zero-padded to a lane-dense width.
    w = raw["final_out"]["w"]
    b = raw["final_out"]["b"]
    n = w.shape[1]
    n_pad = _round_up(n, lane)
    w = jnp.pad(w, ((0, 0), (0, n_pad - n))).astype(compute_dtype)
    b = jnp.pad(b, (0, n_pad - n)).reshape(1, n_pad).astype(jnp.float32)
    return {"layers": layers, "out": (w, b)}


# ----------------------------------------------------------------------------
# Pure-JAX reference with UNFOLDED, full-f32 PyTorch eval-mode semantics
# ----------------------------------------------------------------------------
def reference_forward(x, raw, output_dim, num_classes, eps=_BN_EPS):
    hp = jax.lax.Precision.HIGHEST

    def bn(z, p):
        return (z - p["mean"]) / jnp.sqrt(p["var"] + eps) * p["gamma"] + p["beta"]

    x = bn(x, raw["input_bn"])
    for blk in raw["blocks"] + [raw["final_pre"]]:
        z = jnp.dot(x, blk["lin"]["w"], precision=hp) + blk["lin"]["b"]
        x = jnp.maximum(bn(z, blk["bn"]), 0.0)       # Dropout == identity (eval)
    x = jnp.dot(x, raw["final_out"]["w"], precision=hp) + raw["final_out"]["b"]
    return x.reshape(-1, output_dim, num_classes)


if __name__ == "__main__":
    # Small, shape-consistent configuration of MetaboliteClassifier.
    B = 8
    INPUT_DIM = 256
    HIDDEN_DIMS = [128, 128, 128]
    OUTPUT_DIM = 8
    NUM_CLASSES = 3

    key = jax.random.PRNGKey(0)
    key, xkey = jax.random.split(key)
    x = jax.random.normal(xkey, (B, INPUT_DIM), jnp.float32)

    raw = make_raw_params(key, INPUT_DIM, HIDDEN_DIMS, OUTPUT_DIM, NUM_CLASSES)
    fused = fold_params(raw)

    out = metabolite_classifier_forward(x, fused, OUTPUT_DIM, NUM_CLASSES)
    out = jax.block_until_ready(out)

    ref = reference_forward(x, raw, OUTPUT_DIM, NUM_CLASSES)
    assert out.shape == (B, OUTPUT_DIM, NUM_CLASSES), out.shape
    # 5e-2 tolerance: x/weights are stored in bfloat16 (f32 accumulation and
    # f32 epilogue), while the reference runs fully unfolded in f32 HIGHEST.
    max_err = float(jnp.max(jnp.abs(out - ref)))
    assert jnp.allclose(out, ref, atol=5e-2, rtol=5e-2), \
        f"mismatch, max_err={max_err}"

    print("KERNEL_OK")
</pallas_src>

<mosaic_0001>
module attributes {stable_mosaic.version = 11 : i64} {
  func.func @kernel(%arg0: i32, %arg1: memref<8x256xbf16, #tpu.memory_space<vmem>>, %arg2: memref<256x128xbf16, #tpu.memory_space<vmem>>, %arg3: memref<1x128xf32, #tpu.memory_space<vmem>>, %arg4: memref<128x128xbf16, #tpu.memory_space<vmem>>, %arg5: memref<1x128xf32, #tpu.memory_space<vmem>>, %arg6: memref<128x128xbf16, #tpu.memory_space<vmem>>, %arg7: memref<1x128xf32, #tpu.memory_space<vmem>>, %arg8: memref<128x128xbf16, #tpu.memory_space<vmem>>, %arg9: memref<1x128xf32, #tpu.memory_space<vmem>>, %arg10: memref<128x128xbf16, #tpu.memory_space<vmem>>, %arg11: memref<1x128xf32, #tpu.memory_space<vmem>>, %arg12: memref<8x128xf32, #tpu.memory_space<vmem>>) attributes {dimension_semantics = [#tpu.dimension_semantics<parallel>], iteration_bounds = array<i64: 1>, scalar_prefetch = 0 : i64, scratch_operands = 0 : i64, tpu.core_type = #tpu.core_type<tc>, window_params = [{transform_indices = @transform_0, window_bounds = array<i64: 8, 256>}, {pipeline_mode = #tpu.pipeline_mode<synchronous>, transform_indices = @transform_1, window_bounds = array<i64: 256, 128>}, {pipeline_mode = #tpu.pipeline_mode<synchronous>, transform_indices = @transform_2, window_bounds = array<i64: 1, 128>}, {pipeline_mode = #tpu.pipeline_mode<synchronous>, transform_indices = @transform_3, window_bounds = array<i64: 128, 128>}, {pipeline_mode = #tpu.pipeline_mode<synchronous>, transform_indices = @transform_4, window_bounds = array<i64: 1, 128>}, {pipeline_mode = #tpu.pipeline_mode<synchronous>, transform_indices = @transform_5, window_bounds = array<i64: 128, 128>}, {pipeline_mode = #tpu.pipeline_mode<synchronous>, transform_indices = @transform_6, window_bounds = array<i64: 1, 128>}, {pipeline_mode = #tpu.pipeline_mode<synchronous>, transform_indices = @transform_7, window_bounds = array<i64: 128, 128>}, {pipeline_mode = #tpu.pipeline_mode<synchronous>, transform_indices = @transform_8, window_bounds = array<i64: 1, 128>}, {pipeline_mode = #tpu.pipeline_mode<synchronous>, transform_indices = @transform_9, window_bounds = array<i64: 128, 128>}, {pipeline_mode = #tpu.pipeline_mode<synchronous>, transform_indices = @transform_10, window_bounds = array<i64: 1, 128>}, {transform_indices = @transform_11, window_bounds = array<i64: 8, 128>}]} {
    %c0 = arith.constant 0 : index
    %c0_0 = arith.constant 0 : index
    %0 = vector.load %arg1[%c0, %c0_0] : memref<8x256xbf16, #tpu.memory_space<vmem>>, vector<8x256xbf16>
    %c0_1 = arith.constant 0 : index
    %c0_2 = arith.constant 0 : index
    %1 = vector.load %arg2[%c0_1, %c0_2] : memref<256x128xbf16, #tpu.memory_space<vmem>>, vector<256x128xbf16>
    %cst = arith.constant dense<0.000000e+00> : vector<8x128xf32>
    %2 = tpu.matmul %0, %1, %cst {dimension_numbers = #tpu.dot_dimension_numbers<[1], [0], [0], [1], [0, 0, 1, 1], [], []>} : vector<8x256xbf16>, vector<256x128xbf16>, vector<8x128xf32> -> vector<8x128xf32>
    %c0_3 = arith.constant 0 : index
    %c0_4 = arith.constant 0 : index
    %3 = vector.load %arg3[%c0_3, %c0_4] : memref<1x128xf32, #tpu.memory_space<vmem>>, vector<1x128xf32>
    %4 = vector.broadcast %3 : vector<1x128xf32> to vector<8x128xf32>
    %5 = arith.addf %2, %4 : vector<8x128xf32>
    %cst_5 = arith.constant 0.000000e+00 : f32
    %6 = vector.broadcast %cst_5 : f32 to vector<8x128xf32>
    %7 = arith.maximumf %5, %6 : vector<8x128xf32>
    %8 = arith.truncf %7 : vector<8x128xf32> to vector<8x128xbf16>
    %c0_6 = arith.constant 0 : index
    %c0_7 = arith.constant 0 : index
    %9 = vector.load %arg4[%c0_6, %c0_7] : memref<128x128xbf16, #tpu.memory_space<vmem>>, vector<128x128xbf16>
    %cst_8 = arith.constant dense<0.000000e+00> : vector<8x128xf32>
    %10 = tpu.matmul %8, %9, %cst_8 {dimension_numbers = #tpu.dot_dimension_numbers<[1], [0], [0], [1], [0, 0, 1, 1], [], []>} : vector<8x128xbf16>, vector<128x128xbf16>, vector<8x128xf32> -> vector<8x128xf32>
    %c0_9 = arith.constant 0 : index
    %c0_10 = arith.constant 0 : index
    %11 = vector.load %arg5[%c0_9, %c0_10] : memref<1x128xf32, #tpu.memory_space<vmem>>, vector<1x128xf32>
    %12 = vector.broadcast %11 : vector<1x128xf32> to vector<8x128xf32>
    %13 = arith.addf %10, %12 : vector<8x128xf32>
    %cst_11 = arith.constant 0.000000e+00 : f32
    %14 = vector.broadcast %cst_11 : f32 to vector<8x128xf32>
    %15 = arith.maximumf %13, %14 : vector<8x128xf32>
    %16 = arith.truncf %15 : vector<8x128xf32> to vector<8x128xbf16>
    %c0_12 = arith.constant 0 : index
    %c0_13 = arith.constant 0 : index
    %17 = vector.load %arg6[%c0_12, %c0_13] : memref<128x128xbf16, #tpu.memory_space<vmem>>, vector<128x128xbf16>
    %cst_14 = arith.constant dense<0.000000e+00> : vector<8x128xf32>
    %18 = tpu.matmul %16, %17, %cst_14 {dimension_numbers = #tpu.dot_dimension_numbers<[1], [0], [0], [1], [0, 0, 1, 1], [], []>} : vector<8x128xbf16>, vector<128x128xbf16>, vector<8x128xf32> -> vector<8x128xf32>
    %c0_15 = arith.constant 0 : index
    %c0_16 = arith.constant 0 : index
    %19 = vector.load %arg7[%c0_15, %c0_16] : memref<1x128xf32, #tpu.memory_space<vmem>>, vector<1x128xf32>
    %20 = vector.broadcast %19 : vector<1x128xf32> to vector<8x128xf32>
    %21 = arith.addf %18, %20 : vector<8x128xf32>
    %cst_17 = arith.constant 0.000000e+00 : f32
    %22 = vector.broadcast %cst_17 : f32 to vector<8x128xf32>
    %23 = arith.maximumf %21, %22 : vector<8x128xf32>
    %24 = arith.truncf %23 : vector<8x128xf32> to vector<8x128xbf16>
    %c0_18 = arith.constant 0 : index
    %c0_19 = arith.constant 0 : index
    %25 = vector.load %arg8[%c0_18, %c0_19] : memref<128x128xbf16, #tpu.memory_space<vmem>>, vector<128x128xbf16>
    %cst_20 = arith.constant dense<0.000000e+00> : vector<8x128xf32>
    %26 = tpu.matmul %24, %25, %cst_20 {dimension_numbers = #tpu.dot_dimension_numbers<[1], [0], [0], [1], [0, 0, 1, 1], [], []>} : vector<8x128xbf16>, vector<128x128xbf16>, vector<8x128xf32> -> vector<8x128xf32>
    %c0_21 = arith.constant 0 : index
    %c0_22 = arith.constant 0 : index
    %27 = vector.load %arg9[%c0_21, %c0_22] : memref<1x128xf32, #tpu.memory_space<vmem>>, vector<1x128xf32>
    %28 = vector.broadcast %27 : vector<1x128xf32> to vector<8x128xf32>
    %29 = arith.addf %26, %28 : vector<8x128xf32>
    %cst_23 = arith.constant 0.000000e+00 : f32
    %30 = vector.broadcast %cst_23 : f32 to vector<8x128xf32>
    %31 = arith.maximumf %29, %30 : vector<8x128xf32>
    %32 = arith.truncf %31 : vector<8x128xf32> to vector<8x128xbf16>
    %c0_24 = arith.constant 0 : index
    %c0_25 = arith.constant 0 : index
    %33 = vector.load %arg10[%c0_24, %c0_25] : memref<128x128xbf16, #tpu.memory_space<vmem>>, vector<128x128xbf16>
    %cst_26 = arith.constant dense<0.000000e+00> : vector<8x128xf32>
    %34 = tpu.matmul %32, %33, %cst_26 {dimension_numbers = #tpu.dot_dimension_numbers<[1], [0], [0], [1], [0, 0, 1, 1], [], []>} : vector<8x128xbf16>, vector<128x128xbf16>, vector<8x128xf32> -> vector<8x128xf32>
    %c0_27 = arith.constant 0 : index
    %c0_28 = arith.constant 0 : index
    %35 = vector.load %arg11[%c0_27, %c0_28] : memref<1x128xf32, #tpu.memory_space<vmem>>, vector<1x128xf32>
    %36 = vector.broadcast %35 : vector<1x128xf32> to vector<8x128xf32>
    %37 = arith.addf %34, %36 : vector<8x128xf32>
    %c0_29 = arith.constant 0 : index
    %c0_30 = arith.constant 0 : index
    %38 = vector.load %arg12[%c0_29, %c0_30] : memref<8x128xf32, #tpu.memory_space<vmem>>, vector<8x128xf32>
    tpu.vector_store %arg12[%c0_29, %c0_30], %37 {strides = array<i32>} : memref<8x128xf32, #tpu.memory_space<vmem>>, vector<8x128xf32>,
    return
  }
  func.func @transform_0(%arg0: i32) -> (i32, i32) {
    %c0_i32 = arith.constant 0 : i32
    %c0_i32_0 = arith.constant 0 : i32
    return %arg0, %c0_i32 : i32, i32
  }
  func.func @transform_1(%arg0: i32) -> (i32, i32) {
    %c0_i32 = arith.constant 0 : i32
    %c0_i32_0 = arith.constant 0 : i32
    %c0_i32_1 = arith.constant 0 : i32
    return %c0_i32, %c0_i32_0 : i32, i32
  }
  func.func @transform_2(%arg0: i32) -> (i32, i32) {
    %c0_i32 = arith.constant 0 : i32
    %c0_i32_0 = arith.constant 0 : i32
    %c0_i32_1 = arith.constant 0 : i32
    return %c0_i32, %c0_i32_0 : i32, i32
  }
  func.func @transform_3(%arg0: i32) -> (i32, i32) {
    %c0_i32 = arith.constant 0 : i32
    %c0_i32_0 = arith.constant 0 : i32
    %c0_i32_1 = arith.constant 0 : i32
    return %c0_i32, %c0_i32_0 : i32, i32
  }
  func.func @transform_4(%arg0: i32) -> (i32, i32) {
    %c0_i32 = arith.constant 0 : i32
    %c0_i32_0 = arith.constant 0 : i32
    %c0_i32_1 = arith.constant 0 : i32
    return %c0_i32, %c0_i32_0 : i32, i32
  }
  func.func @transform_5(%arg0: i32) -> (i32, i32) {
    %c0_i32 = arith.constant 0 : i32
    %c0_i32_0 = arith.constant 0 : i32
    %c0_i32_1 = arith.constant 0 : i32
    return %c0_i32, %c0_i32_0 : i32, i32
  }
  func.func @transform_6(%arg0: i32) -> (i32, i32) {
    %c0_i32 = arith.constant 0 : i32
    %c0_i32_0 = arith.constant 0 : i32
    %c0_i32_1 = arith.constant 0 : i32
    return %c0_i32, %c0_i32_0 : i32, i32
  }
  func.func @transform_7(%arg0: i32) -> (i32, i32) {
    %c0_i32 = arith.constant 0 : i32
    %c0_i32_0 = arith.constant 0 : i32
    %c0_i32_1 = arith.constant 0 : i32
    return %c0_i32, %c0_i32_0 : i32, i32
  }
  func.func @transform_8(%arg0: i32) -> (i32, i32) {
    %c0_i32 = arith.constant 0 : i32
    %c0_i32_0 = arith.constant 0 : i32
    %c0_i32_1 = arith.constant 0 : i32
    return %c0_i32, %c0_i32_0 : i32, i32
  }
  func.func @transform_9(%arg0: i32) -> (i32, i32) {
    %c0_i32 = arith.constant 0 : i32
    %c0_i32_0 = arith.constant 0 : i32
    %c0_i32_1 = arith.constant 0 : i32
    return %c0_i32, %c0_i32_0 : i32, i32
  }
  func.func @transform_10(%arg0: i32) -> (i32, i32) {
    %c0_i32 = arith.constant 0 : i32
    %c0_i32_0 = arith.constant 0 : i32
    %c0_i32_1 = arith.constant 0 : i32
    return %c0_i32, %c0_i32_0 : i32, i32
  }
  func.func @transform_11(%arg0: i32) -> (i32, i32) {
    %c0_i32 = arith.constant 0 : i32
    %c0_i32_0 = arith.constant 0 : i32
    return %arg0, %c0_i32 : i32, i32
  }
}

</mosaic_0001>

<bundles_post_ra>
// kernel: tpu_custom_call.1
= control target key start
LH: loop header
LB: loop body
LE: loop exit
PB: predicated region body
PF: predicated region fallthrough
CT: control target
= control target key end

     0   :  { %16 = vsyncpa [#allocation3], 0  ;;  %s1202_s0 = inlined_call_operand.hbm [shape: bf16[8,256], index: 0, kind: input, shape index: {}]   ;;  %s1203_s1 = inlined_call_operand.hbm [shape: bf16[256,128], index: 1, kind: input, shape index: {}]   ;;  %s1204_s2 = inlined_call_operand.vmem [shape: f32[1,128], index: 2, kind: input, shape index: {}]   ;;  %s1205_s3 = inlined_call_operand.hbm [shape: bf16[128,128], index: 3, kind: input, shape index: {}]   ;;  %s1206_s4 = inlined_call_operand.vmem [shape: f32[1,128], index: 4, kind: input, shape index: {}]   ;;  %s1207_s5 = inlined_call_operand.hbm [shape: bf16[128,128], index: 5, kind: input, shape index: {}]   ;;  %s1208_s6 = inlined_call_operand.vmem [shape: f32[1,128], index: 6, kind: input, shape index: {}]   ;;  %s1209_s7 = inlined_call_operand.hbm [shape: bf16[128,128], index: 7, kind: input, shape index: {}]   ;;  %s1210_s8 = inlined_call_operand.vmem [shape: f32[1,128], index: 8, kind: input, shape index: {}]   ;;  %s1211_s9 = inlined_call_operand.hbm [shape: bf16[128,128], index: 9, kind: input, shape index: {}]   ;;  %s1212_s10 = inlined_call_operand.vmem [shape: f32[1,128], index: 10, kind: input, shape index: {}]   ;;  %s1213_s11 = inlined_call_operand.hbm [shape: f32[8,128], index: 11, kind: output, shape index: {}]  }
   0x1   :  { %17 = vsyncpa [#allocation6], 0 }
   0x2   :  { %18 = vsyncpa [#allocation9], 0 }
   0x3   :  { %19 = vsyncpa [#allocation12], 0  ;;  %s36_s19 = sshll.u32 %s1203_s1, 4  ;;  %s37_s19 = int_to_ptr.hbm [resolvable:$true] %s36_s19 }
   0x4   :  { %20 = vsyncpa [#allocation4], 0  ;;  %s1082_s20 = smov [#allocation5]   ;;  %s66_s24 = sshll.u32 %s1207_s5, 4  ;;  %s67_s24 = int_to_ptr.hbm [resolvable:$true] %s66_s24 }
   0x5   :  { %s38_s21 = sshll.u32 %s1082_s20, 4  ;;  %s1083_s25 = smov 64   ;;  %s39_s21 = int_to_ptr.vmem [resolvable:$true] %s38_s21 }
   0x6   :  { %s1084_s26 = smov 4   ;;  %s1085_s27 = smov [#allocation8]  }
   0x7   :  { %44 = dma.hbm_to_vmem [thread:$0]  %s37_s19, 2048, %s39_s21, [#allocation6], %s1083_s25, %s1083_s25, %s1084_s26  }
   0x8   :  { %s68_s28 = sshll.u32 %s1085_s27, 4  ;;  %s26_s30 = sshll.u32 %s1202_s0, 4  ;;  %s69_s28 = int_to_ptr.vmem [resolvable:$true] %s68_s28  ;;  %s27_s30 = int_to_ptr.hbm [resolvable:$true] %s26_s30 }
   0x9   :  { %74 = dma.hbm_to_vmem [thread:$0]  %s67_s24, 1024, %s69_s28, [#allocation9], %s1083_s25, %s1083_s25, %s1084_s26  }
   0xa   :  { %s51_s13 = sshll.u32 %s1205_s3, 4  ;;  %s1086_s14 = smov [#allocation2]   ;;  %s52_s13 = int_to_ptr.hbm [resolvable:$true] %s51_s13 }
   0xb   :  { %s28_s15 = sshll.u32 %s1086_s14, 4  ;;  %s1087_s16 = smov [#allocation7]   ;;  %s29_s15 = int_to_ptr.vmem [resolvable:$true] %s28_s15 }
   0xc   :  { %31 = dma.hbm_to_vmem [thread:$0]  %s27_s30, 128, %s29_s15, [#allocation3]  }
   0xd   :  { %s53_s17 = sshll.u32 %s1087_s16, 4  ;;  %s81_s0 = sshll.u32 %s1209_s7, 4  ;;  %s54_s17 = int_to_ptr.vmem [resolvable:$true] %s53_s17  ;;  %s82_s0 = int_to_ptr.hbm [resolvable:$true] %s81_s0 }
   0xe   :  { %59 = dma.hbm_to_vmem [thread:$0]  %s52_s13, 1024, %s54_s17, [#allocation6], %s1083_s25, %s1083_s25, %s1084_s26  }
   0xf   :  { %s96_s3 = sshll.u32 %s1211_s9, 4  ;;  %s1088_s22 = smov [#allocation10]   ;;  %s97_s3 = int_to_ptr.hbm [resolvable:$true] %s96_s3 }
  0x10   :  { %s83_s23 = sshll.u32 %s1088_s22, 4  ;;  %s1089_s24 = smov [#allocation11]   ;;  %s84_s23 = int_to_ptr.vmem [resolvable:$true] %s83_s23 }
  0x11   :  { %89 = dma.hbm_to_vmem [thread:$0]  %s82_s0, 1024, %s84_s23, [#allocation9], %s1083_s25, %s1083_s25, %s1084_s26  }
  0x12   :  { %s98_s7 = sshll.u32 %s1089_s24, 4  ;;  %s99_s7 = int_to_ptr.vmem [resolvable:$true] %s98_s7 }
  0x13   :  { %104 = dma.hbm_to_vmem [thread:$0]  %s97_s3, 1024, %s99_s7, [#allocation12], %s1083_s25, %s1083_s25, %s1084_s26  }
  0x14   :  { %1072 = dma.done.wait [#allocation3], 128  }
  0x15   :  { %1073 = vsyncadd [#allocation3], 4294967168 }
  0x16   :  { %1074 = dma.done.wait [#allocation6], 3072  }
  0x17   :  { %1075 = vsyncadd [#allocation6], 4294964224 }
  0x18   :  { %1076 = dma.done.wait [#allocation9], 2048  }
  0x19   :  { %1077 = vsyncadd [#allocation9], 4294965248 }
  0x1a   :  { %1078 = dma.done.wait [#allocation12], 1024  }
  0x1b   :  { %1079 = vsyncadd [#allocation12], 4294966272  ;;  %v849_v0 = vld [vmem:[#allocation5 + $0x38] sm:$0xff]  ;;  %v848_v2 = vld [vmem:[#allocation5 + $0x30] sm:$0xff]  ;;  %s1090_s30 = smov [#allocation13]   ;;  %s637_s14 = sshll.u32 %s1213_s11, 4  ;;  %s638_s14 = int_to_ptr.hbm [resolvable:$true] %s637_s14 }
  0x1c   :  { %v857_v1 = vld [vmem:[#allocation5 + $0x78] sm:$0xff]  ;;  %271 = vmatpush.bf16.msra.mxu0 %v849_v0  ;;  %v856_v3 = vld [vmem:[#allocation5 + $0x70] sm:$0xff]  ;;  %v847_v5 = vld [vmem:[#allocation5 + $0x28] sm:$0xff]  ;;  %s635_s5 = sshll.u32 %s1090_s30, 4  ;;  %s636_s5 = int_to_ptr.vmem [resolvable:$true] %s635_s5 }
  0x1d   :  { %284 = vmatpush.bf16.msra.mxu1 %v857_v1  ;;  %v865_v4 = vld [vmem:[#allocation7 + $0x38] sm:$0xff]  ;;  %v855_v6 = vld [vmem:[#allocation5 + $0x68] sm:$0xff]  ;;  %v864_v7 = vld [vmem:[#allocation7 + $0x30] sm:$0xff] }
  0x1e   :  { %367 = vmatpush.bf16.msra.mxu2 %v865_v4  ;;  %v846_v8 = vld [vmem:[#allocation5 + $0x20] sm:$0xff]  ;;  %v863_v10 = vld [vmem:[#allocation7 + $0x28] sm:$0xff]  ;;  %v845_v11 = vld [vmem:[#allocation5 + $0x18] sm:$0xff] }
  0x1f   :  { %v854_v9 = vld [vmem:[#allocation5 + $0x60] sm:$0xff]  ;;  %v853_v12 = vld [vmem:[#allocation5 + $0x58] sm:$0xff]  ;;  %v844_v14 = vld [vmem:[#allocation5 + $0x10] sm:$0xff] }
  0x20   :  { %272 = vmatpush.bf16.msra.mxu0 %v848_v2  ;;  %v862_v13 = vld [vmem:[#allocation7 + $0x20] sm:$0xff]  ;;  %v852_v15 = vld [vmem:[#allocation5 + $0x50] sm:$0xff]  ;;  %v861_v16 = vld [vmem:[#allocation7 + $0x18] sm:$0xff] }
  0x21   :  { %285 = vmatpush.bf16.msra.mxu1 %v856_v3  ;;  %v843_v17 = vld [vmem:[#allocation5 + $0x8] sm:$0xff]  ;;  %v131_v19 = vld [vmem:[#allocation2] sm:$0xff]  ;;  %v860_v20 = vld [vmem:[#allocation7 + $0x10] sm:$0xff] }
  0x22   :  { %368 = vmatpush.bf16.msra.mxu2 %v864_v7  ;;  %v851_v18 = vld [vmem:[#allocation5 + $0x48] sm:$0xff]  ;;  %v169_v21 = vunpack.c.l.b16 %v131_v19  ;;  %v170_v22 = vunpack.c.h.b16 %v131_v19  ;;  %v842_v23 = vld [vmem:[#allocation5] sm:$0xff]  ;;  %v873_v29 = vld [vmem:[#allocation8 + $0x38] sm:$0xff] }
  0x23   :  { %v850_v24 = vld [vmem:[#allocation5 + $0x40] sm:$0xff]  ;;  %v859_v27 = vld [vmem:[#allocation7 + $0x8] sm:$0xff]  ;;  %450 = vmatpush.bf16.msra.mxu3 %v873_v29  ;;  %v872_v30 = vld [vmem:[#allocation8 + $0x30] sm:$0xff] }
  0x24   :  { %273 = vmatpush.bf16.msra.mxu0 %v847_v5  ;;  %v171_v25 = vpack.c.b16 %v169_v21, %v169_v21  ;;  %v172_v26 = vpack.c.b16 %v170_v22, %v170_v22  ;;  %v858_v28 = vld [vmem:[#allocation7] sm:$0xff]  ;;  %v871_v31 = vld [vmem:[#allocation8 + $0x28] sm:$0xff]  ;;  %v869_v33 = vld [vmem:[#allocation8 + $0x18] sm:$0xff] }
  0x25   :  { %286 = vmatpush.bf16.msra.mxu1 %v855_v6  ;;  %v870_v32 = vld [vmem:[#allocation8 + $0x20] sm:$0xff]  ;;  %v868_v34 = vld [vmem:[#allocation8 + $0x10] sm:$0xff]  ;;  %v899_v35 = vld [vmem:[%s1204_s2] ss:$0 sm:$0xff] }
  0x26   :  { %369 = vmatpush.bf16.msra.mxu2 %v863_v10  ;;  %v867_v44 = vld [vmem:[#allocation8 + $0x8] sm:$0xff]  ;;  %v866_v45 = vld [vmem:[#allocation8] sm:$0xff]  ;;  %v881_v46 = vld [vmem:[#allocation10 + $0x38] sm:$0xff] }
  0x27   :  { %451 = vmatpush.bf16.msra.mxu3 %v872_v30  ;;  %v880_v47 = vld [vmem:[#allocation10 + $0x30] sm:$0xff]  ;;  %v879_v48 = vld [vmem:[#allocation10 + $0x28] sm:$0xff]  ;;  %v878_v49 = vld [vmem:[#allocation10 + $0x20] sm:$0xff] }
  0x28   :  { %274 = vmatpush.bf16.msra.mxu0 %v846_v8  ;;  %v877_v50 = vld [vmem:[#allocation10 + $0x18] sm:$0xff]  ;;  %v876_v51 = vld [vmem:[#allocation10 + $0x10] sm:$0xff]  ;;  %v875_v58 = vld [vmem:[#allocation10 + $0x8] sm:$0xff] }
  0x29   :  { %287 = vmatpush.bf16.msra.mxu1 %v854_v9  ;;  %v900_v52 = vld [vmem:[%s1206_s4] ss:$0 sm:$0xff]  ;;  %v874_v59 = vld [vmem:[#allocation10] sm:$0xff]  ;;  %v888_v61 = vld [vmem:[#allocation11 + $0x30] sm:$0xff] }
  0x2a   :  { %370 = vmatpush.bf16.msra.mxu2 %v862_v13  ;;  %v889_v60 = vld [vmem:[#allocation11 + $0x38] sm:$0xff]  ;;  %v887_v62 = vld [vmem:[#allocation11 + $0x28] sm:$0xff]  ;;  %v886_v63 = vld [vmem:[#allocation11 + $0x20] sm:$0xff] }
  0x2b   :  { %452 = vmatpush.bf16.msra.mxu3 %v871_v31  ;;  %v885_v0 = vld [vmem:[#allocation11 + $0x18] sm:$0xff]  ;;  %v884_v1 = vld [vmem:[#allocation11 + $0x10] sm:$0xff]  ;;  %v883_v8 = vld [vmem:[#allocation11 + $0x8] sm:$0xff] }
  0x2c   :  { %275 = vmatpush.bf16.msra.mxu0 %v845_v11  ;;  %v901_v2 = vld [vmem:[%s1208_s6] ss:$0 sm:$0xff]  ;;  %v882_v9 = vld [vmem:[#allocation11] sm:$0xff] }
  0x2d   :  { %288 = vmatpush.bf16.msra.mxu1 %v853_v12  ;;  %v902_v10 = vld [vmem:[%s1210_s8] ss:$0 sm:$0xff] }
  0x2e   :  { %371 = vmatpush.bf16.msra.mxu2 %v861_v16  ;;  %v903_v16 = vld [vmem:[%s1212_s10] ss:$0 sm:$0xff] }
  0x2f   :  { %453 = vmatpush.bf16.msra.mxu3 %v870_v32 }
  0x30   :  { %276 = vmatpush.bf16.msra.mxu0 %v844_v14 }
  0x31   :  { %289 = vmatpush.bf16.msra.mxu1 %v852_v15 }
  0x32   :  { %372 = vmatpush.bf16.msra.mxu2 %v860_v20 }
  0x33   :  { %454 = vmatpush.bf16.msra.mxu3 %v869_v33 }
  0x34   :  { %277 = vmatpush.bf16.msra.mxu0 %v843_v17 }
  0x35   :  { %290 = vmatpush.bf16.msra.mxu1 %v851_v18 }
  0x36   :  { %373 = vmatpush.bf16.msra.mxu2 %v859_v27 }
  0x37   :  { %455 = vmatpush.bf16.msra.mxu3 %v868_v34 }
  0x38   :  { %278 = vmatpush.bf16.msra.mxu0 %v842_v23 }
  0x39   :  { %291 = vmatpush.bf16.msra.mxu1 %v850_v24 }
  0x3a   :  { %374 = vmatpush.bf16.msra.mxu2 %v858_v28 }
  0x3b   :  { %279 = vmatmul.bf16.vlgmr.msra.gmra.mxu0 %v171_v25  ;;  %456 = vmatpush.bf16.msra.mxu3 %v867_v44 }
  0x3c   :  { %292 = vmatmul.bf16.vlgmr.msra.gmra.mxu1 %v172_v26  ;;  %533 = vmatpush.bf16.msrb.mxu0 %v881_v46 }
  0x3d   :  { %616 = vmatpush.bf16.msrb.mxu1 %v889_v60 }
  0x3f   :  { %457 = vmatpush.bf16.msra.mxu3 %v866_v45 }
  0x40   :  { %534 = vmatpush.bf16.msrb.mxu0 %v880_v47 }
  0x41   :  { %617 = vmatpush.bf16.msrb.mxu1 %v888_v61 }
  0x44   :  { %535 = vmatpush.bf16.msrb.mxu0 %v879_v48 }
  0x45   :  { %618 = vmatpush.bf16.msrb.mxu1 %v887_v62 }
  0x48   :  { %536 = vmatpush.bf16.msrb.mxu0 %v878_v49 }
  0x49   :  { %619 = vmatpush.bf16.msrb.mxu1 %v886_v63 }
  0x4c   :  { %537 = vmatpush.bf16.msrb.mxu0 %v877_v50 }
  0x4d   :  { %620 = vmatpush.bf16.msrb.mxu1 %v885_v0 }
  0x50   :  { %538 = vmatpush.bf16.msrb.mxu0 %v876_v51 }
  0x51   :  { %621 = vmatpush.bf16.msrb.mxu1 %v884_v1 }
  0x54   :  { %539 = vmatpush.bf16.msrb.mxu0 %v875_v58 }
  0x55   :  { %622 = vmatpush.bf16.msrb.mxu1 %v883_v8 }
  0x58   :  { %540 = vmatpush.bf16.msrb.mxu0 %v874_v59 }
  0x59   :  { %623 = vmatpush.bf16.msrb.mxu1 %v882_v9 }
  0xb8   :  { %v280_v36 = vpop.f32.mrf.mxu0 }
  0xb9   :  { %v293_v37 = vpop.f32.mrf.mxu1  ;;  %v281_v38 = vadd.f32 %v899_v35, %v280_v36 }
  0xbb   :  { %v294_v39 = vadd.f32 %v293_v37, %v281_v38 }
  0xbd   :  { %v297_v40 = vmax.f32 %v294_v39, 0.0 }
  0xbf   :  { %v298_v41 = vpack.c.bf16 %v297_v40, %v297_v40 }
  0xc0   :  { %v282_v42 = vpop.f32.mrf.mxu0 }
  0xc1   :  { %v295_v43 = vpop.f32.mrf.mxu1  ;;  %375 = vmatmul.bf16.vlgmr.msra.gmra.mxu2 %v298_v41 }
 0x144   :  { %v376_v53 = vpop.f32.mrf.mxu2 }
 0x145   :  { %v377_v54 = vadd.f32 %v900_v52, %v376_v53 }
 0x147   :  { %v380_v55 = vmax.f32 %v377_v54, 0.0 }
 0x149   :  { %v381_v56 = vpack.c.bf16 %v380_v55, %v380_v55 }
 0x14b   :  { %458 = vmatmul.bf16.vlgmr.msra.gmra.mxu3 %v381_v56 }
 0x14c   :  { %v378_v57 = vpop.f32.mrf.mxu2 }
 0x1ce   :  { %v459_v3 = vpop.f32.mrf.mxu3 }
 0x1cf   :  { %v460_v4 = vadd.f32 %v901_v2, %v459_v3 }
 0x1d1   :  { %v463_v5 = vmax.f32 %v460_v4, 0.0 }
 0x1d3   :  { %v464_v6 = vpack.c.bf16 %v463_v5, %v463_v5 }
 0x1d5   :  { %541 = vmatmul.bf16.vlgmr.msrb.gmra.mxu0 %v464_v6 }
 0x1d6   :  { %v461_v7 = vpop.f32.mrf.mxu3 }
 0x252   :  { %v542_v11 = vpop.f32.mrf.mxu0 }
 0x253   :  { %v543_v12 = vadd.f32 %v902_v10, %v542_v11 }
 0x255   :  { %v546_v13 = vmax.f32 %v543_v12, 0.0 }
 0x257   :  { %v547_v14 = vpack.c.bf16 %v546_v13, %v546_v13 }
 0x259   :  { %624 = vmatmul.bf16.vlgmr.msrb.gmra.mxu1 %v547_v14 }
 0x25a   :  { %v544_v15 = vpop.f32.mrf.mxu0 }
 0x2d6   :  { %v625_v17 = vpop.f32.mrf.mxu1 }
 0x2d7   :  { %v626_v18 = vadd.f32 %v903_v16, %v625_v17 }
 0x2d9   :  { %629 = vst [vmem:[#allocation13] sm:$0xff] %v626_v18 }
 0x2da   :  { %640 = dma.vmem_to_hbm [thread:$0]  %s636_s5, 128, %s638_s14, [#allocation4]  }
 0x2de   :  { %v627_v19 = vpop.f32.mrf.mxu1 }
 0x2df   :  { %1080 = dma.done.wait [#allocation4], 128  }
 0x2e0   :  { %1081 = vsyncadd [#allocation4], 4294967168 }
 0x2e1   :  { %645 = vsyncpa [#allocation3], 1 }
 0x2e2   :  { %646 = vsyncpa [#allocation6], 1 }
 0x2e3   :  { %647 = vsyncpa [#allocation9], 1 }
 0x2e4   :  { %648 = vsyncpa [#allocation12], 1 }
 0x2e5   :  { %649 = vsyncpa [#allocation4], 1 }

</bundles_post_ra>
